<compile_context>
chip_gen: v5e
topology: v5e:2x2
jax: 0.10.0
libtpu: 0.0.40
codegen_flags: <defaults>
</compile_context>

<pallas_src>
import jax
import jax.numpy as jnp
from jax import lax
from jax.experimental import pallas as pl
from jax.experimental.pallas import tpu as pltpu


def _cdiv(a, b):
    return -(-a // b)


def _round_up(x, m):
    return ((x + m - 1) // m) * m


def _vmem_capacity_bytes():
    try:
        return int(pltpu.get_tpu_info().vmem_capacity_bytes)
    except Exception:
        return 64 << 20  # conservative fallback (v7x per-core VMEM)


def _plan_tiles(M, K, N, itemsize):
    """Pick (tm, tk, tn) and grid extents under a generation-aware VMEM budget."""
    cap = _vmem_capacity_bytes()
    budget = int(cap * 0.68)  # ~43 MiB on v7x (64 MiB), ~87 MiB on v5e/v6e (128 MiB)

    def tile_bytes(r, c, isz):
        # VMEM layout pads tiles to (8, 128) granules.
        return _round_up(max(r, 1), 8) * _round_up(max(c, 1), 128) * isz

    def footprint(tm_, tk_, tn_):
        # double-buffered x / w / bias / out tiles + f32 accumulator scratch
        return (2 * (tile_bytes(tm_, tk_, itemsize) + tile_bytes(tk_, tn_, itemsize)
                     + tile_bytes(1, tn_, itemsize) + tile_bytes(tm_, tn_, itemsize))
                + tile_bytes(tm_, tn_, 4))

    # --- K (contraction) tile: full K preferred; otherwise a 128-multiple chosen
    # so that 256x256 output tiles still fit (crucial on v7x's 64 MiB VMEM).
    if K <= 512 or footprint(256, K, 256) <= budget:
        tk = K
    else:
        tk = min(2048, _round_up(K, 128))
        while tk > 512 and footprint(256, tk, 256) > budget:
            tk //= 2
    nk = _cdiv(K, tk)
    if nk == 1:
        tk = K

    # --- N tile: lane-dense (multiple of 128), padding-aware, as large as fits.
    tm_probe = min(max(_round_up(M, 8), 8), 256)
    tn_cands = [c for c in range(128, min(_round_up(N, 128), 2048) + 1, 128)
                if footprint(tm_probe, tk, c) <= budget]
    if not tn_cands:
        tn_cands = [128]
    tn = min(tn_cands, key=lambda t: (_round_up(N, t) - N, -t))
    nj = _cdiv(N, tn)

    # --- M tile: multiple of 8 (or exactly M for a single block), padding-aware.
    cap_m = min(_round_up(M, 8), 1024)
    tm_cands = [t for t in range(8, cap_m + 1, 8) if footprint(t, tk, tn) <= budget]
    if M <= cap_m and footprint(M, tk, tn) <= budget:
        tm_cands.append(M)  # exact single row block: zero row padding / waste
    if not tm_cands:
        tm_cands = [8]
    tm = min(tm_cands, key=lambda t: (_cdiv(M, t) * t - M, -t))
    ni = _cdiv(M, tm)

    vmem_limit = min(footprint(tm, tk, tn) + (8 << 20), cap - (4 << 20))
    return tm, tk, tn, ni, nj, nk, int(vmem_limit)


def _make_kernel(*, K, tk, single_k, ragged_k, use_bf16_mxu):
    def _prep(x, w):
        if use_bf16_mxu:
            x = x.astype(jnp.bfloat16)
            w = w.astype(jnp.bfloat16)
        return x, w

    if single_k:
        def kernel(x_ref, w_ref, b_ref, o_ref):
            x, w = _prep(x_ref[...], w_ref[...])
            acc = jnp.dot(x, w, preferred_element_type=jnp.float32)
            o_ref[...] = (acc + b_ref[...].astype(jnp.float32)).astype(o_ref.dtype)
        return kernel

    def kernel(x_ref, w_ref, b_ref, o_ref, acc_ref):
        k = pl.program_id(2)

        @pl.when(k == 0)
        def _init():
            acc_ref[...] = jnp.zeros_like(acc_ref)

        x, w = _prep(x_ref[...], w_ref[...])
        if ragged_k:
            # The last K block reads past K; zero the out-of-range columns so
            # they pair with the zero-padded weight rows and contribute exactly 0.
            col = lax.broadcasted_iota(jnp.int32, x.shape, 1) + k * tk
            x = jnp.where(col < K, x, jnp.zeros_like(x))

        acc_ref[...] += jnp.dot(x, w, preferred_element_type=jnp.float32)

        @pl.when(k == pl.num_programs(2) - 1)
        def _finalize():
            o_ref[...] = (acc_ref[...]
                          + b_ref[...].astype(jnp.float32)).astype(o_ref.dtype)

    return kernel


def _linear_pallas(x2d, weight, bias, *, use_bf16_mxu=False):
    """y = x2d @ weight.T + bias  (PyTorch nn.Linear semantics), tiled on the MXU."""
    M, K = x2d.shape
    N = weight.shape[0]
    itemsize = jnp.dtype(x2d.dtype).itemsize
    tm, tk, tn, ni, nj, nk, vmem_limit = _plan_tiles(M, K, N, itemsize)

    K_pad = nk * tk          # == K when nk == 1
    N_pad = nj * tn

    # Transpose the (small) weight once to (K, N) and zero-pad weight/bias only.
    # The (large) activation x is never padded or copied in HBM.
    w_t = jnp.pad(jnp.transpose(weight), ((0, K_pad - K), (0, N_pad - N)))
    b2d = jnp.pad(bias.reshape(1, N), ((0, 0), (0, N_pad - N)))

    # Grid order: keep whichever operand saves more redundant HBM traffic resident
    # across the inner axis (only matters when nk == 1 and nj > 1).
    if nk == 1 and nj > 1:
        x_bytes = M * K * itemsize
        w_bytes = K_pad * N_pad * itemsize
        j_outer = nj * x_bytes + w_bytes <= x_bytes + ni * w_bytes
    else:
        j_outer = True

    if j_outer:
        grid = (nj, ni, nk)
        x_map = lambda j, i, k: (i, k)
        w_map = lambda j, i, k: (k, j)
        b_map = lambda j, i, k: (0, j)
        o_map = lambda j, i, k: (i, j)
    else:
        grid = (ni, nj, nk)
        x_map = lambda i, j, k: (i, k)
        w_map = lambda i, j, k: (k, j)
        b_map = lambda i, j, k: (0, j)
        o_map = lambda i, j, k: (i, j)

    kernel = _make_kernel(K=K, tk=tk, single_k=(nk == 1),
                          ragged_k=(K % tk != 0), use_bf16_mxu=use_bf16_mxu)
    scratch = [] if nk == 1 else [pltpu.VMEM((tm, tn), jnp.float32)]

    cost = pl.CostEstimate(
        flops=2 * M * K * N_pad,
        transcendentals=0,
        bytes_accessed=itemsize * (M * K + K_pad * N_pad + N_pad + M * N_pad),
    )

    out = pl.pallas_call(
        kernel,
        out_shape=jax.ShapeDtypeStruct((M, N_pad), x2d.dtype),
        grid_spec=pltpu.PrefetchScalarGridSpec(
            num_scalar_prefetch=0,
            grid=grid,
            in_specs=[
                pl.BlockSpec((tm, tk), x_map),   # x row/K tile (partial tails clipped)
                pl.BlockSpec((tk, tn), w_map),   # weight (K, N) tile
                pl.BlockSpec((1, tn), b_map),    # bias tile
            ],
            out_specs=pl.BlockSpec((tm, tn), o_map),
            scratch_shapes=scratch,
        ),
        compiler_params=pltpu.CompilerParams(
            dimension_semantics=("parallel", "parallel", "arbitrary"),
            vmem_limit_bytes=vmem_limit,
        ),
        cost_estimate=cost,
    )(x2d, w_t, b2d)

    return out[:, :N] if N_pad != N else out


def time_distributed_linear(x, weight, bias, *, batch_first=False, use_bf16_mxu=False):
    """JAX/Pallas equivalent of TimeDistributed(nn.Linear(in, out)).

    weight: (out_features, in_features)   -- PyTorch Linear layout
    bias:   (out_features,)
    """
    if x.ndim <= 2:
        # rank <= 2: module applied directly (same tiled path, no special case)
        x2d = x if x.ndim == 2 else x.reshape(1, -1)
        y = _linear_pallas(x2d, weight, bias, use_bf16_mxu=use_bf16_mxu)
        return y if x.ndim == 2 else y.reshape(-1)

    K = x.shape[-1]
    x_flat = x.reshape(-1, K)              # == .contiguous().view(-1, F)
    y = _linear_pallas(x_flat, weight, bias, use_bf16_mxu=use_bf16_mxu)
    N = y.shape[-1]
    if batch_first:
        return y.reshape(x.shape[0], -1, N)
    return y.reshape(-1, x.shape[1], N)


if __name__ == "__main__":
    key = jax.random.PRNGKey(0)
    kx, kw, kb, kx2 = jax.random.split(key, 4)

    # Case 1: batch_first=True.
    B, T, F_in, F_out = 2, 8, 32, 32
    x = jax.random.normal(kx, (B, T, F_in), dtype=jnp.float32)
    weight = jax.random.normal(kw, (F_out, F_in), dtype=jnp.float32) * 0.1
    bias = jax.random.normal(kb, (F_out,), dtype=jnp.float32) * 0.1

    y = time_distributed_linear(x, weight, bias, batch_first=True)
    y = jax.block_until_ready(y)
    y_ref = (x.reshape(-1, F_in) @ weight.T + bias).reshape(B, -1, F_out)
    assert y.shape == (B, T, F_out)
    assert jnp.allclose(y, y_ref, atol=1e-5, rtol=1e-5)

    # Case 2: ragged row count (exercises partial-row-block handling), batch_first=False.
    T2 = 7
    x2 = jax.random.normal(kx2, (B, T2, F_in), dtype=jnp.float32)
    y2 = time_distributed_linear(x2, weight, bias, batch_first=False)
    y2 = jax.block_until_ready(y2)
    y2_ref = (x2.reshape(-1, F_in) @ weight.T + bias).reshape(-1, T2, F_out)
    assert y2.shape == y2_ref.shape
    assert jnp.allclose(y2, y2_ref, atol=1e-5, rtol=1e-5)

    print("KERNEL_OK")
</pallas_src>

<mosaic_0001>
module attributes {stable_mosaic.version = 11 : i64} {
  func.func @kernel(%arg0: i32, %arg1: i32, %arg2: i32, %arg3: memref<16x32xf32, #tpu.memory_space<vmem>>, %arg4: memref<32x128xf32, #tpu.memory_space<vmem>>, %arg5: memref<1x128xf32, #tpu.memory_space<vmem>>, %arg6: memref<16x128xf32, #tpu.memory_space<vmem>>) attributes {dimension_semantics = [#tpu.dimension_semantics<parallel>, #tpu.dimension_semantics<parallel>, #tpu.dimension_semantics<arbitrary>], iteration_bounds = array<i64: 1, 1, 1>, scalar_prefetch = 0 : i64, scratch_operands = 0 : i64, tpu.core_type = #tpu.core_type<tc>, window_params = [{transform_indices = @transform_0, window_bounds = array<i64: 16, 32>}, {transform_indices = @transform_1, window_bounds = array<i64: 32, 128>}, {transform_indices = @transform_2, window_bounds = array<i64: 1, 128>}, {transform_indices = @transform_3, window_bounds = array<i64: 16, 128>}]} {
    %c0 = arith.constant 0 : index
    %c0_0 = arith.constant 0 : index
    %0 = vector.load %arg3[%c0, %c0_0] : memref<16x32xf32, #tpu.memory_space<vmem>>, vector<16x32xf32>
    %c0_1 = arith.constant 0 : index
    %c0_2 = arith.constant 0 : index
    %1 = vector.load %arg4[%c0_1, %c0_2] : memref<32x128xf32, #tpu.memory_space<vmem>>, vector<32x128xf32>
    %cst = arith.constant dense<0.000000e+00> : vector<16x128xf32>
    %2 = tpu.matmul %0, %1, %cst {dimension_numbers = #tpu.dot_dimension_numbers<[1], [0], [0], [1], [0, 0, 1, 1], [], []>} : vector<16x32xf32>, vector<32x128xf32>, vector<16x128xf32> -> vector<16x128xf32>
    %c0_3 = arith.constant 0 : index
    %c0_4 = arith.constant 0 : index
    %3 = vector.load %arg5[%c0_3, %c0_4] : memref<1x128xf32, #tpu.memory_space<vmem>>, vector<1x128xf32>
    %4 = vector.broadcast %3 : vector<1x128xf32> to vector<16x128xf32>
    %5 = arith.addf %2, %4 : vector<16x128xf32>
    %c0_5 = arith.constant 0 : index
    %c0_6 = arith.constant 0 : index
    %6 = vector.load %arg6[%c0_5, %c0_6] : memref<16x128xf32, #tpu.memory_space<vmem>>, vector<16x128xf32>
    tpu.vector_store %arg6[%c0_5, %c0_6], %5 {strides = array<i32>} : memref<16x128xf32, #tpu.memory_space<vmem>>, vector<16x128xf32>,
    return
  }
  func.func @transform_0(%arg0: i32, %arg1: i32, %arg2: i32) -> (i32, i32) {
    %c0_i32 = arith.constant 0 : i32
    return %arg1, %arg2 : i32, i32
  }
  func.func @transform_1(%arg0: i32, %arg1: i32, %arg2: i32) -> (i32, i32) {
    %c0_i32 = arith.constant 0 : i32
    return %arg2, %arg0 : i32, i32
  }
  func.func @transform_2(%arg0: i32, %arg1: i32, %arg2: i32) -> (i32, i32) {
    %c0_i32 = arith.constant 0 : i32
    %c0_i32_0 = arith.constant 0 : i32
    return %c0_i32, %arg0 : i32, i32
  }
  func.func @transform_3(%arg0: i32, %arg1: i32, %arg2: i32) -> (i32, i32) {
    %c0_i32 = arith.constant 0 : i32
    return %arg1, %arg0 : i32, i32
  }
}

</mosaic_0001>

<bundles_post_ra>
// kernel: tpu_custom_call.1
= control target key start
LH: loop header
LB: loop body
LE: loop exit
PB: predicated region body
PF: predicated region fallthrough
CT: control target
= control target key end

     0   :  { %8 = vsyncpa [#allocation3], 0  ;;  %s245_s0 = inlined_call_operand.hbm [shape: f32[16,32], index: 0, kind: input, shape index: {}]   ;;  %s246_s1 = inlined_call_operand.hbm [shape: f32[32,128], index: 1, kind: input, shape index: {}]   ;;  %s247_s2 = inlined_call_operand.vmem [shape: f32[1,128], index: 2, kind: input, shape index: {}]   ;;  %s248_s3 = inlined_call_operand.hbm [shape: f32[16,128], index: 3, kind: output, shape index: {}]  }
   0x1   :  { %9 = vsyncpa [#allocation6], 0 }
   0x2   :  { %10 = vsyncpa [#allocation4], 0  ;;  %s15_s14 = sshll.u32 %s245_s0, 4  ;;  %s199_s15 = smov [#allocation2]   ;;  %s16_s14 = int_to_ptr.hbm [resolvable:$true] %s15_s14 }
   0x3   :  { %s17_s16 = sshll.u32 %s199_s15, 4  ;;  %s28_s19 = sshll.u32 %s246_s1, 4  ;;  %s18_s16 = int_to_ptr.vmem [resolvable:$true] %s17_s16  ;;  %s29_s19 = int_to_ptr.hbm [resolvable:$true] %s28_s19 }
   0x4   :  { %s200_s20 = smov 128   ;;  %s201_s21 = smov 8  }
   0x5   :  { %23 = dma.hbm_to_vmem [thread:$0]  %s16_s14, 256, %s18_s16, [#allocation3], %s200_s20, %s200_s20, %s201_s21  }
   0x6   :  { %s202_s22 = smov [#allocation5]  }
   0x7   :  { %s30_s23 = sshll.u32 %s202_s22, 4  ;;  %s31_s23 = int_to_ptr.vmem [resolvable:$true] %s30_s23 }
   0x8   :  { %36 = dma.hbm_to_vmem [thread:$0]  %s29_s19, 512, %s31_s23, [#allocation6], %s200_s20, %s200_s20, %s201_s21  }
   0x9   :  { %193 = dma.done.wait [#allocation3], 256  }
   0xa   :  { %194 = vsyncadd [#allocation3], 4294967040 }
   0xb   :  { %195 = dma.done.wait [#allocation6], 512  }
   0xc   :  { %196 = vsyncadd [#allocation6], 4294966784  ;;  %v52_v0 = vld [vmem:[#allocation5 + $0x18] sm:$0xff]  ;;  %v51_v1 = vld [vmem:[#allocation5 + $0x10] sm:$0xff]  ;;  %vm57_vm0 = vcmask 261120   ;;  %s203_s24 = smov [#allocation7]  }
   0xd   :  { %76 = vmatpush.msra.mxu0 %v52_v0  ;;  %111 = vmatpush.msra.mxu1 %v52_v0  ;;  %v50_v2 = vld [vmem:[#allocation5 + $0x8] sm:$0xff]  ;;  %v49_v3 = vld [vmem:[#allocation5] sm:$0xff]  ;;  %v47_v4 = vld [vmem:[#allocation2] sm:$0xff]  ;;  %s93_s25 = sshll.u32 %s203_s24, 4  ;;  %s95_s28 = sshll.u32 %s248_s3, 4  ;;  %s94_s25 = int_to_ptr.vmem [resolvable:$true] %s93_s25  ;;  %s96_s28 = int_to_ptr.hbm [resolvable:$true] %s95_s28 }
   0xe   :  { %v48_v5 = vld [vmem:[#allocation2 + $0x8] sm:$0xff]  ;;  %v120_v6 = vld [vmem:[%s247_s2] ss:$0 sm:$0xff] }
   0xf   :  { %77 = vmatpush.msra.mxu0 %v51_v1  ;;  %112 = vmatpush.msra.mxu1 %v51_v1 }
  0x11   :  { %78 = vmatpush.msra.mxu0 %v50_v2  ;;  %113 = vmatpush.msra.mxu1 %v50_v2 }
  0x13   :  { %79 = vmatpush.msra.mxu0 %v49_v3  ;;  %114 = vmatpush.msra.mxu1 %v49_v3 }
  0x14   :  { %109 = vmatmul.msk.f32.vlgmr.msra.gmra.mxu0 %vm57_vm0, %v47_v4  ;;  %110 = vmatmul.msk.f32.vlgmr.msra.gmra.mxu1 %vm57_vm0, %v48_v5 }
  0x91   :  { %v81_v7 = vpop.f32.mrf.mxu0  ;;  %v84_v8 = vpop.f32.mrf.mxu1 }
  0x92   :  { %v82_v9 = vadd.f32 %v120_v6, %v81_v7  ;;  %v85_v10 = vadd.f32 %v120_v6, %v84_v8 }
  0x94   :  { %87 = vst [vmem:[#allocation7] sm:$0xff] %v82_v9 }
  0x95   :  { %88 = vst [vmem:[#allocation7 + $0x8] sm:$0xff] %v85_v10 }
  0x96   :  { %101 = dma.vmem_to_hbm [thread:$0]  %s94_s25, 256, %s96_s28, [#allocation4], %s200_s20, %s200_s20, %s201_s21  }
  0x97   :  { %197 = dma.done.wait [#allocation4], 256  }
  0x98   :  { %198 = vsyncadd [#allocation4], 4294967040 }
  0x99   :  { %106 = vsyncpa [#allocation3], 1 }
  0x9a   :  { %107 = vsyncpa [#allocation6], 1 }
  0x9b   :  { %108 = vsyncpa [#allocation4], 1 }

</bundles_post_ra>
